<compile_context>
chip_gen: v7x
topology: tpu7x:2x2x1
jax: 0.10.0
libtpu: 0.0.40
codegen_flags: <defaults>
</compile_context>

<pallas_src>
import jax
import jax.numpy as jnp
from jax import lax
from jax.experimental import pallas as pl
from jax.experimental.pallas import tpu as pltpu


def _elu(v):
    # ELU(alpha=1). Clamp arg of exp so the unselected branch can't overflow.
    return jnp.where(v > 0.0, v, jnp.exp(jnp.minimum(v, 0.0)) - 1.0)


def _make_kernel(NB, H, W, Cin, Cout, pool):
    WCi = W * Cin
    WCo = W * Cout
    M = NB * H

    def kernel(*refs):
        if pool:
            (x_ref, b1a_ref, b1b_ref, b1c_ref, b2_ref,
             bias1_ref, bias2_ref, biasr_ref, q_ref, p_ref,
             out_ref, xpad, c1pad) = refs
        else:
            (x_ref, b1a_ref, b1b_ref, b1c_ref, b2_ref,
             bias1_ref, bias2_ref, biasr_ref,
             out_ref, xpad, c1pad) = refs

        # Zero only the two H-border rows of the persistent padded scratches;
        # the interiors are fully overwritten below every step, so this keeps the
        # pad invariant without re-zeroing the whole buffer (and stays safe under
        # "parallel" grid semantics).
        zx = jnp.zeros((NB, 1, WCi), jnp.float32)
        zc = jnp.zeros((NB, 1, WCo), jnp.float32)
        xpad[:, 0:1, :] = zx
        xpad[:, H + 1:H + 2, :] = zx
        c1pad[:, 0:1, :] = zc
        c1pad[:, H + 1:H + 2, :] = zc

        # In-kernel H-padding of the input (replaces the wrapper-side jnp.pad).
        xpad[:, 1:H + 1, :] = x_ref[...]

        def rows(ref, dy, ncols):
            return ref[:, dy:dy + H, :].reshape(M, ncols)

        r0 = rows(xpad, 0, WCi)
        r1 = rows(xpad, 1, WCi)
        r2 = rows(xpad, 2, WCi)

        # conv1: 3 band matmuls; the dy=1 matmul also carries the fused 1x1 residual
        # in its extra WCo output columns.
        t1 = jnp.dot(r1, b1b_ref[...], preferred_element_type=jnp.float32)
        acc1 = (t1[:, :WCo]
                + jnp.dot(r0, b1a_ref[...], preferred_element_type=jnp.float32)
                + jnp.dot(r2, b1c_ref[...], preferred_element_type=jnp.float32)
                + bias1_ref[...])
        res = t1[:, WCo:] + biasr_ref[...]

        c1 = _elu(acc1)
        c1pad[:, 1:H + 1, :] = c1.reshape(NB, H, WCo)

        # conv2: 3 band matmuls over the H-padded intermediate.
        acc2 = bias2_ref[...]
        for dy in range(3):
            acc2 = acc2 + jnp.dot(rows(c1pad, dy, WCo), b2_ref[dy],
                                  preferred_element_type=jnp.float32)
        y = _elu(acc2) + res            # (M, W*Cout), lane-dense

        if pool:
            # 2x2 average pooling as two MXU matmuls (column pairs, then row pairs).
            yq = jnp.dot(y, q_ref[...], preferred_element_type=jnp.float32)
            out_ref[...] = jnp.dot(p_ref[...], yq,
                                   preferred_element_type=jnp.float32)
        else:
            out_ref[...] = y

    return kernel


def dfenc_block(x_nchw, params, bottleneck=False, batch_block=None):
    """Pallas forward of DFEncBlock. Input/output are NCHW like the PyTorch module."""
    N, Cin, H, W = x_nchw.shape
    Cout = params["inconv_w"].shape[1]
    pool = not bottleneck
    if pool:
        assert H % 2 == 0 and W % 2 == 0, "AvgPool2d(2) requires even H and W"
    Ho, Wo = (H // 2, W // 2) if pool else (H, W)

    NB = N if batch_block is None else batch_block
    assert N % NB == 0, "batch_block must divide N"

    f32 = jnp.float32
    WCi, WCo = W * Cin, W * Cout

    # NCHW -> (N, H, W*Cin) with channels interleaved in the lane dim.
    x2d = jnp.transpose(x_nchw, (0, 2, 3, 1)).astype(f32).reshape(N, H, WCi)

    # dx-selection tensor S[d, s, x] = 1 iff s == x + d - 1 (encodes SAME padding in W).
    xs = jnp.arange(W)
    S = jnp.stack([(xs[:, None] == (xs[None, :] + d - 1)).astype(f32)
                   for d in range(3)])                               # (3, W, W)

    w1 = params["conv1_w"].astype(f32)      # (3, 3, Cin, Cout)
    w2 = params["conv2_w"].astype(f32)      # (3, 3, Cout, Cout)
    win = params["inconv_w"].astype(f32)    # (Cin, Cout)

    def band(w_dy, Ci, Co):                 # w_dy: (3, Ci, Co) -> (W*Ci, W*Co)
        return jnp.einsum("dsx,dio->sixo", S, w_dy).reshape(W * Ci, W * Co)

    B1 = [band(w1[dy], Cin, Cout) for dy in range(3)]
    B2 = jnp.stack([band(w2[dy], Cout, Cout) for dy in range(3)])    # (3, WCo, WCo)
    Bres = jnp.einsum("sx,io->sixo", jnp.eye(W, dtype=f32), win
                      ).reshape(WCi, WCo)                            # block-diag 1x1 conv
    B1b = jnp.concatenate([B1[1], Bres], axis=1)                     # fused dy=1 + residual

    bias1 = jnp.tile(params["conv1_b"].reshape(1, Cout).astype(f32), (1, W))
    bias2 = jnp.tile(params["conv2_b"].reshape(1, Cout).astype(f32), (1, W))
    biasr = jnp.tile(params["inconv_b"].reshape(1, Cout).astype(f32), (1, W))

    inputs = [x2d, B1[0], B1b, B1[2], B2, bias1, bias2, biasr]
    in_specs = [
        pl.BlockSpec((NB, H, WCi), lambda g: (g, 0, 0)),
        pl.BlockSpec((WCi, WCo), lambda g: (0, 0)),
        pl.BlockSpec((WCi, 2 * WCo), lambda g: (0, 0)),
        pl.BlockSpec((WCi, WCo), lambda g: (0, 0)),
        pl.BlockSpec((3, WCo, WCo), lambda g: (0, 0, 0)),
        pl.BlockSpec((1, WCo), lambda g: (0, 0)),
        pl.BlockSpec((1, WCo), lambda g: (0, 0)),
        pl.BlockSpec((1, WCo), lambda g: (0, 0)),
    ]
    if pool:
        # Column-pair averaging matrix (per channel) and block-diagonal row-pair matrix.
        SP = 0.5 * ((xs[:, None] // 2) == jnp.arange(Wo)[None, :]).astype(f32)   # (W, Wo)
        Q = jnp.einsum("sx,io->sixo", SP, jnp.eye(Cout, dtype=f32)
                       ).reshape(WCo, Wo * Cout)
        P1 = 0.5 * (jnp.arange(Ho)[:, None] ==
                    (jnp.arange(H)[None, :] // 2)).astype(f32)                   # (Ho, H)
        P = jnp.kron(jnp.eye(NB, dtype=f32), P1)                                 # (NB*Ho, NB*H)
        inputs += [Q, P]
        in_specs += [pl.BlockSpec((WCo, Wo * Cout), lambda g: (0, 0)),
                     pl.BlockSpec((NB * Ho, NB * H), lambda g: (0, 0))]

    kernel = _make_kernel(NB, H, W, Cin, Cout, pool)

    out2d = pl.pallas_call(
        kernel,
        out_shape=jax.ShapeDtypeStruct((N * Ho, Wo * Cout), f32),
        grid_spec=pltpu.PrefetchScalarGridSpec(
            num_scalar_prefetch=0,
            grid=(N // NB,),
            in_specs=in_specs,
            out_specs=pl.BlockSpec((NB * Ho, Wo * Cout), lambda g: (g, 0)),
            scratch_shapes=[pltpu.VMEM((NB, H + 2, WCi), f32),
                            pltpu.VMEM((NB, H + 2, WCo), f32)],
        ),
        compiler_params=pltpu.CompilerParams(
            dimension_semantics=("parallel",),
            vmem_limit_bytes=64 * 1024 * 1024),
    )(*inputs)

    # (N*Ho, Wo*Cout) -> NCHW
    out = out2d.reshape(N, Ho, Wo, Cout)
    return jnp.transpose(out, (0, 3, 1, 2))


def dfenc_block_reference(x_nchw, params, bottleneck=False):
    """Pure-JAX reference (mirrors the PyTorch forward) for verification."""
    Cin = x_nchw.shape[1]
    Cout = params["inconv_w"].shape[1]
    x = jnp.transpose(x_nchw, (0, 2, 3, 1)).astype(jnp.float32)
    dn = ("NHWC", "HWIO", "NHWC")

    win = params["inconv_w"].reshape(1, 1, Cin, Cout)
    res = lax.conv_general_dilated(x, win, (1, 1), "SAME",
                                   dimension_numbers=dn) + params["inconv_b"].reshape(1, 1, 1, -1)
    c = jax.nn.elu(lax.conv_general_dilated(x, params["conv1_w"], (1, 1), "SAME",
                                            dimension_numbers=dn)
                   + params["conv1_b"].reshape(1, 1, 1, -1))
    c = jax.nn.elu(lax.conv_general_dilated(c, params["conv2_w"], (1, 1), "SAME",
                                            dimension_numbers=dn)
                   + params["conv2_b"].reshape(1, 1, 1, -1))
    y = c + res
    if not bottleneck:
        N, H, W, C = y.shape
        y = y.reshape(N, H // 2, 2, W // 2, 2, C).mean(axis=(2, 4))
    return jnp.transpose(y, (0, 3, 1, 2))


def init_params(key, chn_in, chn_out):
    k = jax.random.split(key, 6)
    s = 0.1
    return {
        "inconv_w": s * jax.random.normal(k[0], (chn_in, chn_out), jnp.float32),
        "inconv_b": s * jax.random.normal(k[1], (1, chn_out), jnp.float32),
        "conv1_w": s * jax.random.normal(k[2], (3, 3, chn_in, chn_out), jnp.float32),
        "conv1_b": s * jax.random.normal(k[3], (1, chn_out), jnp.float32),
        "conv2_w": s * jax.random.normal(k[4], (3, 3, chn_out, chn_out), jnp.float32),
        "conv2_b": s * jax.random.normal(k[5], (1, chn_out), jnp.float32),
    }


if __name__ == "__main__":
    key = jax.random.PRNGKey(0)
    kx, kp = jax.random.split(key)

    N, Cin, Cout, H, W = 2, 4, 8, 16, 16
    x = jax.random.normal(kx, (N, Cin, H, W), jnp.float32)
    params = init_params(kp, Cin, Cout)

    # default path (bottleneck=False -> avg-pool 2x2)
    out = dfenc_block(x, params, bottleneck=False)
    out = jax.block_until_ready(out)
    ref = dfenc_block_reference(x, params, bottleneck=False)
    assert out.shape == (N, Cout, H // 2, W // 2), out.shape
    assert jnp.allclose(out, ref, atol=1e-4, rtol=1e-4), float(jnp.abs(out - ref).max())

    # bottleneck path (no pooling)
    out_b = dfenc_block(x, params, bottleneck=True)
    out_b = jax.block_until_ready(out_b)
    ref_b = dfenc_block_reference(x, params, bottleneck=True)
    assert out_b.shape == (N, Cout, H, W), out_b.shape
    assert jnp.allclose(out_b, ref_b, atol=1e-4, rtol=1e-4), float(jnp.abs(out_b - ref_b).max())

    # per-batch-element grid path (exercises grid > 1)
    out_g = dfenc_block(x, params, bottleneck=False, batch_block=1)
    out_g = jax.block_until_ready(out_g)
    assert jnp.allclose(out_g, ref, atol=1e-4, rtol=1e-4), float(jnp.abs(out_g - ref).max())

    print("KERNEL_OK")
</pallas_src>

<mosaic_0001>
module attributes {stable_mosaic.version = 11 : i64} {
  func.func @kernel(%arg0: i32, %arg1: memref<2x16x64xf32, #tpu.memory_space<vmem>>, %arg2: memref<64x128xf32, #tpu.memory_space<vmem>>, %arg3: memref<64x256xf32, #tpu.memory_space<vmem>>, %arg4: memref<64x128xf32, #tpu.memory_space<vmem>>, %arg5: memref<3x128x128xf32, #tpu.memory_space<vmem>>, %arg6: memref<1x128xf32, #tpu.memory_space<vmem>>, %arg7: memref<1x128xf32, #tpu.memory_space<vmem>>, %arg8: memref<1x128xf32, #tpu.memory_space<vmem>>, %arg9: memref<128x64xf32, #tpu.memory_space<vmem>>, %arg10: memref<16x32xf32, #tpu.memory_space<vmem>>, %arg11: memref<16x64xf32, #tpu.memory_space<vmem>>, %arg12: memref<2x18x64xf32, #tpu.memory_space<vmem>>, %arg13: memref<2x18x128xf32, #tpu.memory_space<vmem>>) attributes {dimension_semantics = [#tpu.dimension_semantics<parallel>], iteration_bounds = array<i64: 1>, scalar_prefetch = 0 : i64, scratch_operands = 2 : i64, tpu.core_type = #tpu.core_type<tc>, window_params = [{transform_indices = @transform_0, window_bounds = array<i64: 2, 16, 64>}, {pipeline_mode = #tpu.pipeline_mode<synchronous>, transform_indices = @transform_1, window_bounds = array<i64: 64, 128>}, {pipeline_mode = #tpu.pipeline_mode<synchronous>, transform_indices = @transform_2, window_bounds = array<i64: 64, 256>}, {pipeline_mode = #tpu.pipeline_mode<synchronous>, transform_indices = @transform_3, window_bounds = array<i64: 64, 128>}, {pipeline_mode = #tpu.pipeline_mode<synchronous>, transform_indices = @transform_4, window_bounds = array<i64: 3, 128, 128>}, {pipeline_mode = #tpu.pipeline_mode<synchronous>, transform_indices = @transform_5, window_bounds = array<i64: 1, 128>}, {pipeline_mode = #tpu.pipeline_mode<synchronous>, transform_indices = @transform_6, window_bounds = array<i64: 1, 128>}, {pipeline_mode = #tpu.pipeline_mode<synchronous>, transform_indices = @transform_7, window_bounds = array<i64: 1, 128>}, {pipeline_mode = #tpu.pipeline_mode<synchronous>, transform_indices = @transform_8, window_bounds = array<i64: 128, 64>}, {pipeline_mode = #tpu.pipeline_mode<synchronous>, transform_indices = @transform_9, window_bounds = array<i64: 16, 32>}, {transform_indices = @transform_10, window_bounds = array<i64: 16, 64>}]} {
    %cst = arith.constant 0.000000e+00 : f32
    %0 = vector.broadcast %cst : f32 to vector<2x1x64xf32>
    %cst_0 = arith.constant 0.000000e+00 : f32
    %1 = vector.broadcast %cst_0 : f32 to vector<2x1x128xf32>
    %c0 = arith.constant 0 : index
    %c0_1 = arith.constant 0 : index
    %c0_2 = arith.constant 0 : index
    %2 = vector.load %arg12[%c0, %c0_1, %c0_2] : memref<2x18x64xf32, #tpu.memory_space<vmem>>, vector<2x1x64xf32>
    tpu.vector_store %arg12[%c0, %c0_1, %c0_2], %0 {strides = array<i32>} : memref<2x18x64xf32, #tpu.memory_space<vmem>>, vector<2x1x64xf32>,
    %c0_3 = arith.constant 0 : index
    %c17 = arith.constant 17 : index
    %c0_4 = arith.constant 0 : index
    %3 = vector.load %arg12[%c0_3, %c17, %c0_4] : memref<2x18x64xf32, #tpu.memory_space<vmem>>, vector<2x1x64xf32>
    tpu.vector_store %arg12[%c0_3, %c17, %c0_4], %0 {strides = array<i32>} : memref<2x18x64xf32, #tpu.memory_space<vmem>>, vector<2x1x64xf32>,
    %c0_5 = arith.constant 0 : index
    %c0_6 = arith.constant 0 : index
    %c0_7 = arith.constant 0 : index
    %4 = vector.load %arg13[%c0_5, %c0_6, %c0_7] : memref<2x18x128xf32, #tpu.memory_space<vmem>>, vector<2x1x128xf32>
    tpu.vector_store %arg13[%c0_5, %c0_6, %c0_7], %1 {strides = array<i32>} : memref<2x18x128xf32, #tpu.memory_space<vmem>>, vector<2x1x128xf32>,
    %c0_8 = arith.constant 0 : index
    %c17_9 = arith.constant 17 : index
    %c0_10 = arith.constant 0 : index
    %5 = vector.load %arg13[%c0_8, %c17_9, %c0_10] : memref<2x18x128xf32, #tpu.memory_space<vmem>>, vector<2x1x128xf32>
    tpu.vector_store %arg13[%c0_8, %c17_9, %c0_10], %1 {strides = array<i32>} : memref<2x18x128xf32, #tpu.memory_space<vmem>>, vector<2x1x128xf32>,
    %c0_11 = arith.constant 0 : index
    %c0_12 = arith.constant 0 : index
    %c0_13 = arith.constant 0 : index
    %6 = vector.load %arg1[%c0_11, %c0_12, %c0_13] : memref<2x16x64xf32, #tpu.memory_space<vmem>>, vector<2x16x64xf32>
    %c0_14 = arith.constant 0 : index
    %c1 = arith.constant 1 : index
    %c0_15 = arith.constant 0 : index
    %7 = vector.load %arg12[%c0_14, %c1, %c0_15] : memref<2x18x64xf32, #tpu.memory_space<vmem>>, vector<2x16x64xf32>
    tpu.vector_store %arg12[%c0_14, %c1, %c0_15], %6 {strides = array<i32>} : memref<2x18x64xf32, #tpu.memory_space<vmem>>, vector<2x16x64xf32>,
    %c0_16 = arith.constant 0 : index
    %c0_17 = arith.constant 0 : index
    %c0_18 = arith.constant 0 : index
    %8 = vector.load %arg12[%c0_16, %c0_17, %c0_18] : memref<2x18x64xf32, #tpu.memory_space<vmem>>, vector<2x16x64xf32>
    %9 = vector.shape_cast %8 : vector<2x16x64xf32> to vector<32x64xf32>
    %c0_19 = arith.constant 0 : index
    %c1_20 = arith.constant 1 : index
    %c0_21 = arith.constant 0 : index
    %10 = vector.load %arg12[%c0_19, %c1_20, %c0_21] : memref<2x18x64xf32, #tpu.memory_space<vmem>>, vector<2x16x64xf32>
    %11 = vector.shape_cast %10 : vector<2x16x64xf32> to vector<32x64xf32>
    %c0_22 = arith.constant 0 : index
    %c2 = arith.constant 2 : index
    %c0_23 = arith.constant 0 : index
    %12 = vector.load %arg12[%c0_22, %c2, %c0_23] : memref<2x18x64xf32, #tpu.memory_space<vmem>>, vector<2x16x64xf32>
    %13 = vector.shape_cast %12 : vector<2x16x64xf32> to vector<32x64xf32>
    %c0_24 = arith.constant 0 : index
    %c0_25 = arith.constant 0 : index
    %14 = vector.load %arg3[%c0_24, %c0_25] : memref<64x256xf32, #tpu.memory_space<vmem>>, vector<64x256xf32>
    %cst_26 = arith.constant dense<0.000000e+00> : vector<32x256xf32>
    %15 = tpu.matmul %11, %14, %cst_26 {dimension_numbers = #tpu.dot_dimension_numbers<[1], [0], [0], [1], [0, 0, 1, 1], [], []>} : vector<32x64xf32>, vector<64x256xf32>, vector<32x256xf32> -> vector<32x256xf32>
    %16 = vector.extract_strided_slice %15 {offsets = [0, 0], sizes = [32, 128], strides = [1, 1]} : vector<32x256xf32> to vector<32x128xf32>
    %c0_27 = arith.constant 0 : index
    %c0_28 = arith.constant 0 : index
    %17 = vector.load %arg2[%c0_27, %c0_28] : memref<64x128xf32, #tpu.memory_space<vmem>>, vector<64x128xf32>
    %cst_29 = arith.constant dense<0.000000e+00> : vector<32x128xf32>
    %18 = tpu.matmul %9, %17, %cst_29 {dimension_numbers = #tpu.dot_dimension_numbers<[1], [0], [0], [1], [0, 0, 1, 1], [], []>} : vector<32x64xf32>, vector<64x128xf32>, vector<32x128xf32> -> vector<32x128xf32>
    %19 = arith.addf %16, %18 : vector<32x128xf32>
    %c0_30 = arith.constant 0 : index
    %c0_31 = arith.constant 0 : index
    %20 = vector.load %arg4[%c0_30, %c0_31] : memref<64x128xf32, #tpu.memory_space<vmem>>, vector<64x128xf32>
    %cst_32 = arith.constant dense<0.000000e+00> : vector<32x128xf32>
    %21 = tpu.matmul %13, %20, %cst_32 {dimension_numbers = #tpu.dot_dimension_numbers<[1], [0], [0], [1], [0, 0, 1, 1], [], []>} : vector<32x64xf32>, vector<64x128xf32>, vector<32x128xf32> -> vector<32x128xf32>
    %22 = arith.addf %19, %21 : vector<32x128xf32>
    %c0_33 = arith.constant 0 : index
    %c0_34 = arith.constant 0 : index
    %23 = vector.load %arg6[%c0_33, %c0_34] : memref<1x128xf32, #tpu.memory_space<vmem>>, vector<1x128xf32>
    %24 = vector.broadcast %23 : vector<1x128xf32> to vector<32x128xf32>
    %25 = arith.addf %22, %24 : vector<32x128xf32>
    %26 = vector.extract_strided_slice %15 {offsets = [0, 128], sizes = [32, 128], strides = [1, 1]} : vector<32x256xf32> to vector<32x128xf32>
    %c0_35 = arith.constant 0 : index
    %c0_36 = arith.constant 0 : index
    %27 = vector.load %arg8[%c0_35, %c0_36] : memref<1x128xf32, #tpu.memory_space<vmem>>, vector<1x128xf32>
    %28 = vector.broadcast %27 : vector<1x128xf32> to vector<32x128xf32>
    %29 = arith.addf %26, %28 : vector<32x128xf32>
    %cst_37 = arith.constant 0.000000e+00 : f32
    %30 = vector.broadcast %cst_37 : f32 to vector<32x128xf32>
    %31 = arith.cmpf ogt, %25, %30 : vector<32x128xf32>
    %cst_38 = arith.constant 0.000000e+00 : f32
    %32 = vector.broadcast %cst_38 : f32 to vector<32x128xf32>
    %33 = arith.minimumf %25, %32 : vector<32x128xf32>
    %34 = math.exp %33 : vector<32x128xf32>
    %cst_39 = arith.constant 1.000000e+00 : f32
    %35 = vector.broadcast %cst_39 : f32 to vector<32x128xf32>
    %36 = arith.subf %34, %35 : vector<32x128xf32>
    %37 = arith.select %31, %25, %36 : vector<32x128xi1>, vector<32x128xf32>
    %38 = vector.shape_cast %37 : vector<32x128xf32> to vector<2x16x128xf32>
    %c0_40 = arith.constant 0 : index
    %c1_41 = arith.constant 1 : index
    %c0_42 = arith.constant 0 : index
    %39 = vector.load %arg13[%c0_40, %c1_41, %c0_42] : memref<2x18x128xf32, #tpu.memory_space<vmem>>, vector<2x16x128xf32>
    tpu.vector_store %arg13[%c0_40, %c1_41, %c0_42], %38 {strides = array<i32>} : memref<2x18x128xf32, #tpu.memory_space<vmem>>, vector<2x16x128xf32>,
    %c0_43 = arith.constant 0 : index
    %c0_44 = arith.constant 0 : index
    %40 = vector.load %arg7[%c0_43, %c0_44] : memref<1x128xf32, #tpu.memory_space<vmem>>, vector<1x128xf32>
    %c0_45 = arith.constant 0 : index
    %c0_46 = arith.constant 0 : index
    %c0_47 = arith.constant 0 : index
    %41 = vector.load %arg13[%c0_45, %c0_46, %c0_47] : memref<2x18x128xf32, #tpu.memory_space<vmem>>, vector<2x16x128xf32>
    %42 = vector.shape_cast %41 : vector<2x16x128xf32> to vector<32x128xf32>
    %c0_48 = arith.constant 0 : index
    %c0_49 = arith.constant 0 : index
    %c0_50 = arith.constant 0 : index
    %43 = vector.load %arg5[%c0_48, %c0_49, %c0_50] : memref<3x128x128xf32, #tpu.memory_space<vmem>>, vector<1x128x128xf32>
    %44 = vector.shape_cast %43 : vector<1x128x128xf32> to vector<128x128xf32>
    %cst_51 = arith.constant dense<0.000000e+00> : vector<32x128xf32>
    %45 = tpu.matmul %42, %44, %cst_51 {dimension_numbers = #tpu.dot_dimension_numbers<[1], [0], [0], [1], [0, 0, 1, 1], [], []>} : vector<32x128xf32>, vector<128x128xf32>, vector<32x128xf32> -> vector<32x128xf32>
    %46 = vector.broadcast %40 : vector<1x128xf32> to vector<32x128xf32>
    %47 = arith.addf %46, %45 : vector<32x128xf32>
    %c0_52 = arith.constant 0 : index
    %c1_53 = arith.constant 1 : index
    %c0_54 = arith.constant 0 : index
    %48 = vector.load %arg13[%c0_52, %c1_53, %c0_54] : memref<2x18x128xf32, #tpu.memory_space<vmem>>, vector<2x16x128xf32>
    %49 = vector.shape_cast %48 : vector<2x16x128xf32> to vector<32x128xf32>
    %c1_55 = arith.constant 1 : index
    %c0_56 = arith.constant 0 : index
    %c0_57 = arith.constant 0 : index
    %50 = vector.load %arg5[%c1_55, %c0_56, %c0_57] : memref<3x128x128xf32, #tpu.memory_space<vmem>>, vector<1x128x128xf32>
    %51 = vector.shape_cast %50 : vector<1x128x128xf32> to vector<128x128xf32>
    %cst_58 = arith.constant dense<0.000000e+00> : vector<32x128xf32>
    %52 = tpu.matmul %49, %51, %cst_58 {dimension_numbers = #tpu.dot_dimension_numbers<[1], [0], [0], [1], [0, 0, 1, 1], [], []>} : vector<32x128xf32>, vector<128x128xf32>, vector<32x128xf32> -> vector<32x128xf32>
    %53 = arith.addf %47, %52 : vector<32x128xf32>
    %c0_59 = arith.constant 0 : index
    %c2_60 = arith.constant 2 : index
    %c0_61 = arith.constant 0 : index
    %54 = vector.load %arg13[%c0_59, %c2_60, %c0_61] : memref<2x18x128xf32, #tpu.memory_space<vmem>>, vector<2x16x128xf32>
    %55 = vector.shape_cast %54 : vector<2x16x128xf32> to vector<32x128xf32>
    %c2_62 = arith.constant 2 : index
    %c0_63 = arith.constant 0 : index
    %c0_64 = arith.constant 0 : index
    %56 = vector.load %arg5[%c2_62, %c0_63, %c0_64] : memref<3x128x128xf32, #tpu.memory_space<vmem>>, vector<1x128x128xf32>
    %57 = vector.shape_cast %56 : vector<1x128x128xf32> to vector<128x128xf32>
    %cst_65 = arith.constant dense<0.000000e+00> : vector<32x128xf32>
    %58 = tpu.matmul %55, %57, %cst_65 {dimension_numbers = #tpu.dot_dimension_numbers<[1], [0], [0], [1], [0, 0, 1, 1], [], []>} : vector<32x128xf32>, vector<128x128xf32>, vector<32x128xf32> -> vector<32x128xf32>
    %59 = arith.addf %53, %58 : vector<32x128xf32>
    %cst_66 = arith.constant 0.000000e+00 : f32
    %60 = vector.broadcast %cst_66 : f32 to vector<32x128xf32>
    %61 = arith.cmpf ogt, %59, %60 : vector<32x128xf32>
    %cst_67 = arith.constant 0.000000e+00 : f32
    %62 = vector.broadcast %cst_67 : f32 to vector<32x128xf32>
    %63 = arith.minimumf %59, %62 : vector<32x128xf32>
    %64 = math.exp %63 : vector<32x128xf32>
    %cst_68 = arith.constant 1.000000e+00 : f32
    %65 = vector.broadcast %cst_68 : f32 to vector<32x128xf32>
    %66 = arith.subf %64, %65 : vector<32x128xf32>
    %67 = arith.select %61, %59, %66 : vector<32x128xi1>, vector<32x128xf32>
    %68 = arith.addf %67, %29 : vector<32x128xf32>
    %c0_69 = arith.constant 0 : index
    %c0_70 = arith.constant 0 : index
    %69 = vector.load %arg9[%c0_69, %c0_70] : memref<128x64xf32, #tpu.memory_space<vmem>>, vector<128x64xf32>
    %cst_71 = arith.constant dense<0.000000e+00> : vector<32x64xf32>
    %70 = tpu.matmul %68, %69, %cst_71 {dimension_numbers = #tpu.dot_dimension_numbers<[1], [0], [0], [1], [0, 0, 1, 1], [], []>} : vector<32x128xf32>, vector<128x64xf32>, vector<32x64xf32> -> vector<32x64xf32>
    %c0_72 = arith.constant 0 : index
    %c0_73 = arith.constant 0 : index
    %71 = vector.load %arg10[%c0_72, %c0_73] : memref<16x32xf32, #tpu.memory_space<vmem>>, vector<16x32xf32>
    %cst_74 = arith.constant dense<0.000000e+00> : vector<16x64xf32>
    %72 = tpu.matmul %71, %70, %cst_74 {dimension_numbers = #tpu.dot_dimension_numbers<[1], [0], [0], [1], [0, 0, 1, 1], [], []>} : vector<16x32xf32>, vector<32x64xf32>, vector<16x64xf32> -> vector<16x64xf32>
    %c0_75 = arith.constant 0 : index
    %c0_76 = arith.constant 0 : index
    %73 = vector.load %arg11[%c0_75, %c0_76] : memref<16x64xf32, #tpu.memory_space<vmem>>, vector<16x64xf32>
    tpu.vector_store %arg11[%c0_75, %c0_76], %72 {strides = array<i32>} : memref<16x64xf32, #tpu.memory_space<vmem>>, vector<16x64xf32>,
    return
  }
  func.func @transform_0(%arg0: i32) -> (i32, i32, i32) {
    %c0_i32 = arith.constant 0 : i32
    %c0_i32_0 = arith.constant 0 : i32
    %c0_i32_1 = arith.constant 0 : i32
    return %arg0, %c0_i32, %c0_i32_0 : i32, i32, i32
  }
  func.func @transform_1(%arg0: i32) -> (i32, i32) {
    %c0_i32 = arith.constant 0 : i32
    %c0_i32_0 = arith.constant 0 : i32
    %c0_i32_1 = arith.constant 0 : i32
    return %c0_i32, %c0_i32_0 : i32, i32
  }
  func.func @transform_2(%arg0: i32) -> (i32, i32) {
    %c0_i32 = arith.constant 0 : i32
    %c0_i32_0 = arith.constant 0 : i32
    %c0_i32_1 = arith.constant 0 : i32
    return %c0_i32, %c0_i32_0 : i32, i32
  }
  func.func @transform_3(%arg0: i32) -> (i32, i32) {
    %c0_i32 = arith.constant 0 : i32
    %c0_i32_0 = arith.constant 0 : i32
    %c0_i32_1 = arith.constant 0 : i32
    return %c0_i32, %c0_i32_0 : i32, i32
  }
  func.func @transform_4(%arg0: i32) -> (i32, i32, i32) {
    %c0_i32 = arith.constant 0 : i32
    %c0_i32_0 = arith.constant 0 : i32
    %c0_i32_1 = arith.constant 0 : i32
    %c0_i32_2 = arith.constant 0 : i32
    return %c0_i32, %c0_i32_0, %c0_i32_1 : i32, i32, i32
  }
  func.func @transform_5(%arg0: i32) -> (i32, i32) {
    %c0_i32 = arith.constant 0 : i32
    %c0_i32_0 = arith.constant 0 : i32
    %c0_i32_1 = arith.constant 0 : i32
    return %c0_i32, %c0_i32_0 : i32, i32
  }
  func.func @transform_6(%arg0: i32) -> (i32, i32) {
    %c0_i32 = arith.constant 0 : i32
    %c0_i32_0 = arith.constant 0 : i32
    %c0_i32_1 = arith.constant 0 : i32
    return %c0_i32, %c0_i32_0 : i32, i32
  }
  func.func @transform_7(%arg0: i32) -> (i32, i32) {
    %c0_i32 = arith.constant 0 : i32
    %c0_i32_0 = arith.constant 0 : i32
    %c0_i32_1 = arith.constant 0 : i32
    return %c0_i32, %c0_i32_0 : i32, i32
  }
  func.func @transform_8(%arg0: i32) -> (i32, i32) {
    %c0_i32 = arith.constant 0 : i32
    %c0_i32_0 = arith.constant 0 : i32
    %c0_i32_1 = arith.constant 0 : i32
    return %c0_i32, %c0_i32_0 : i32, i32
  }
  func.func @transform_9(%arg0: i32) -> (i32, i32) {
    %c0_i32 = arith.constant 0 : i32
    %c0_i32_0 = arith.constant 0 : i32
    %c0_i32_1 = arith.constant 0 : i32
    return %c0_i32, %c0_i32_0 : i32, i32
  }
  func.func @transform_10(%arg0: i32) -> (i32, i32) {
    %c0_i32 = arith.constant 0 : i32
    %c0_i32_0 = arith.constant 0 : i32
    return %arg0, %c0_i32 : i32, i32
  }
}

</mosaic_0001>

<bundles_post_ra>
// kernel: tpu_custom_call.1
= control target key start
LH: loop header
LB: loop body
LE: loop exit
PB: predicated region body
PF: predicated region fallthrough
CT: control target
= control target key end

     0   :  { %15 = vsyncpa [#allocation5], 0  ;;  %s2279_s0 = inlined_call_operand.hbm [shape: f32[2,16,64], index: 0, kind: input, shape index: {}]   ;;  %s2280_s1 = inlined_call_operand.hbm [shape: f32[64,128], index: 1, kind: input, shape index: {}]   ;;  %s2281_s2 = inlined_call_operand.hbm [shape: f32[64,256], index: 2, kind: input, shape index: {}]   ;;  %s2282_s3 = inlined_call_operand.hbm [shape: f32[64,128], index: 3, kind: input, shape index: {}]   ;;  %s2283_s4 = inlined_call_operand.hbm [shape: f32[3,128,128], index: 4, kind: input, shape index: {}]   ;;  %s2284_s5 = inlined_call_operand.hbm [shape: f32[1,128], index: 5, kind: input, shape index: {}]   ;;  %s2285_s6 = inlined_call_operand.hbm [shape: f32[1,128], index: 6, kind: input, shape index: {}]   ;;  %s2286_s7 = inlined_call_operand.hbm [shape: f32[1,128], index: 7, kind: input, shape index: {}]   ;;  %s2287_s8 = inlined_call_operand.hbm [shape: f32[128,64], index: 8, kind: input, shape index: {}]   ;;  %s2288_s9 = inlined_call_operand.hbm [shape: f32[16,32], index: 9, kind: input, shape index: {}]   ;;  %s2289_s10 = inlined_call_operand.hbm [shape: f32[16,64], index: 10, kind: output, shape index: {}]  }
   0x1   :  { %16 = vsyncpa [#allocation8], 0 }
   0x2   :  { %17 = vsyncpa [#allocation11], 0 }
   0x3   :  { %18 = vsyncpa [#allocation14], 0 }
   0x4   :  { %19 = vsyncpa [#allocation17], 0 }
   0x5   :  { %20 = vsyncpa [#allocation20], 0 }
   0x6   :  { %21 = vsyncpa [#allocation6], 0  ;;  %s1980_s13 = smov [#allocation7]   ;;  %s1981_s15 = smov [#allocation10]  }
   0x7   :  { %s39_s14 = sshll.u32 %s1980_s13, 4  ;;  %s63_s16 = sshll.u32 %s1981_s15, 4  ;;  %s40_s14 = int_to_ptr.vmem [resolvable:$true] %s39_s14  ;;  %s2051_s16 = int_to_ptr.vmem [resolvable:$true] %s63_s16 }
   0x8   :  { %s1724_s19 = scalar_lea.hbm %s2280_s1, 1024 }
   0x9   :  { %p1725_p0 = scmp.ne.s32.totalorder %s2280_s1, %s1724_s19  ;;  %p1728_p1 = scmp.lt.u32.totalorder %s1724_s19, %s2280_s1 }
   0xb   :  { %p1730_p2 = pnand %p1728_p1, %p1725_p0 }
   0xd   :  { %1733 = shalt.err (!%p1730_p2)
}
   0xe   :  { %s1734_s24 = scalar_lea.vmem %s40_s14, 1024  ;;  %p1739_p4 = scmp.lt.s32.totalorder %s40_s14, %s40_s14 }
   0xf   :  { %p1735_p3 = scmp.ne.s32.totalorder %s40_s14, %s1734_s24  ;;  %p1740_p5 = scmp.lt.s32.totalorder %s1734_s24, %s1734_s24 }
  0x11   :  { %p1741_p6 = por %p1740_p5, %p1739_p4 }
  0x13   :  { %p1742_p7 = pnand %p1741_p6, %p1735_p3 }
  0x15   :  { %1745 = shalt.err (!%p1742_p7)
}
  0x16   :  { %s1982_s25 = smov 128   ;;  %s1983_s26 = smov 8  }
  0x17   :  { %45 = dma.hbm_to_vmem [thread:$0]  %s2280_s1, 1024, %s40_s14, [#allocation8], %s1982_s25, %s1982_s25, %s1983_s26  }
  0x18   :  { %s1746_s11 = scalar_lea.hbm %s2282_s3, 1024 }
  0x19   :  { %p1747_p8 = scmp.ne.s32.totalorder %s2282_s3, %s1746_s11  ;;  %p1750_p9 = scmp.lt.u32.totalorder %s1746_s11, %s2282_s3 }
  0x1b   :  { %p1752_p10 = pnand %p1750_p9, %p1747_p8 }
  0x1d   :  { %1755 = shalt.err (!%p1752_p10)
}
  0x1e   :  { %s1756_s18 = scalar_lea.vmem %s2051_s16, 1024  ;;  %p1761_p12 = scmp.lt.s32.totalorder %s2051_s16, %s2051_s16 }
  0x1f   :  { %p1757_p11 = scmp.ne.s32.totalorder %s2051_s16, %s1756_s18  ;;  %p1762_p13 = scmp.lt.s32.totalorder %s1756_s18, %s1756_s18 }
  0x21   :  { %p1763_p0 = por %p1762_p13, %p1761_p12 }
  0x23   :  { %p1764_p1 = pnand %p1763_p0, %p1757_p11 }
  0x25   :  { %1767 = shalt.err (!%p1764_p1)
}
  0x26   :  { %69 = dma.hbm_to_vmem [thread:$0]  %s2282_s3, 1024, %s2051_s16, [#allocation11], %s1982_s25, %s1982_s25, %s1983_s26  }
  0x27   :  { %s1984_s19 = smov [#allocation13]   ;;  %s1985_s21 = smov [#allocation16]  }
  0x28   :  { %s88_s20 = sshll.u32 %s1984_s19, 4  ;;  %s108_s22 = sshll.u32 %s1985_s21, 4  ;;  %s89_s20 = int_to_ptr.vmem [resolvable:$true] %s88_s20  ;;  %s109_s22 = int_to_ptr.vmem [resolvable:$true] %s108_s22 }
  0x29   :  { %s1768_s27 = scalar_lea.hbm %s2284_s5, 16 }
  0x2a   :  { %p1769_p2 = scmp.ne.s32.totalorder %s2284_s5, %s1768_s27  ;;  %p1772_p3 = scmp.lt.u32.totalorder %s1768_s27, %s2284_s5 }
  0x2c   :  { %p1774_p4 = pnand %p1772_p3, %p1769_p2 }
  0x2e   :  { %1777 = shalt.err (!%p1774_p4)
}
  0x2f   :  { %s1778_s3 = scalar_lea.vmem %s89_s20, 16  ;;  %s1782_s16 = scalar_lea.vmem %s89_s20, 32 }
  0x30   :  { %p1779_p5 = scmp.ne.s32.totalorder %s89_s20, %s1778_s3  ;;  %p1783_p6 = scmp.lt.s32.totalorder %s89_s20, %s89_s20 }
  0x31   :  { %p1784_p7 = scmp.lt.s32.totalorder %s1782_s16, %s1778_s3 }
  0x33   :  { %p1785_p8 = por %p1784_p7, %p1783_p6 }
  0x35   :  { %p1786_p9 = pnand %p1785_p8, %p1779_p5 }
  0x37   :  { %1789 = shalt.err (!%p1786_p9)
}
  0x38   :  { %91 = dma.hbm_to_vmem [thread:$0]  %s2284_s5, 16, %s89_s20, [#allocation14]  }
  0x39   :  { %s1790_s18 = scalar_lea.hbm %s2286_s7, 16 }
  0x3a   :  { %p1791_p10 = scmp.ne.s32.totalorder %s2286_s7, %s1790_s18  ;;  %p1794_p11 = scmp.lt.u32.totalorder %s1790_s18, %s2286_s7 }
  0x3c   :  { %p1796_p12 = pnand %p1794_p11, %p1791_p10 }
  0x3e   :  { %1799 = shalt.err (!%p1796_p12)
}
  0x3f   :  { %s1800_s23 = scalar_lea.vmem %s109_s22, 16  ;;  %s1804_s24 = scalar_lea.vmem %s109_s22, 32 }
  0x40   :  { %p1801_p13 = scmp.ne.s32.totalorder %s109_s22, %s1800_s23  ;;  %p1805_p0 = scmp.lt.s32.totalorder %s109_s22, %s109_s22 }
  0x41   :  { %p1806_p1 = scmp.lt.s32.totalorder %s1804_s24, %s1800_s23 }
  0x43   :  { %p1807_p2 = por %p1806_p1, %p1805_p0 }
  0x45   :  { %p1808_p3 = pnand %p1807_p2, %p1801_p13 }
  0x47   :  { %1811 = shalt.err (!%p1808_p3)
}
  0x48   :  { %111 = dma.hbm_to_vmem [thread:$0]  %s2286_s7, 16, %s109_s22, [#allocation17]  }
  0x49   :  { %s1986_s27 = smov [#allocation4]   ;;  %s1987_s29 = smov [#allocation9]  }
  0x4a   :  { %s27_s28 = sshll.u32 %s1986_s27, 4  ;;  %s51_s30 = sshll.u32 %s1987_s29, 4  ;;  %s28_s28 = int_to_ptr.vmem [resolvable:$true] %s27_s28  ;;  %s2112_s30 = int_to_ptr.vmem [resolvable:$true] %s51_s30 }
  0x4b   :  { %s1812_s16 = scalar_lea.hbm %s2279_s0, 512 }
  0x4c   :  { %p1813_p4 = scmp.ne.s32.totalorder %s2279_s0, %s1812_s16  ;;  %p1816_p5 = scmp.lt.u32.totalorder %s1812_s16, %s2279_s0 }
  0x4e   :  { %p1818_p6 = pnand %p1816_p5, %p1813_p4 }
  0x50   :  { %1821 = shalt.err (!%p1818_p6)
}
  0x51   :  { %s1822_s7 = scalar_lea.vmem %s28_s28, 512  ;;  %p1827_p8 = scmp.lt.s32.totalorder %s28_s28, %s28_s28 }
  0x52   :  { %p1823_p7 = scmp.ne.s32.totalorder %s28_s28, %s1822_s7  ;;  %p1828_p9 = scmp.lt.s32.totalorder %s1822_s7, %s1822_s7 }
  0x54   :  { %p1829_p10 = por %p1828_p9, %p1827_p8 }
  0x56   :  { %p1830_p11 = pnand %p1829_p10, %p1823_p7 }
  0x58   :  { %1833 = shalt.err (!%p1830_p11)
}
  0x59   :  { %33 = dma.hbm_to_vmem [thread:$0]  %s2279_s0, 512, %s28_s28, [#allocation5], %s1982_s25, %s1982_s25, %s1983_s26  }
  0x5a   :  { %s1834_s19 = scalar_lea.hbm %s2281_s2, 2048 }
  0x5b   :  { %p1835_p12 = scmp.ne.s32.totalorder %s2281_s2, %s1834_s19  ;;  %p1838_p13 = scmp.lt.u32.totalorder %s1834_s19, %s2281_s2 }
  0x5d   :  { %p1840_p0 = pnand %p1838_p13, %p1835_p12 }
  0x5f   :  { %1843 = shalt.err (!%p1840_p0)
}
  0x60   :  { %s1844_s20 = scalar_lea.vmem %s2112_s30, 2048  ;;  %p1849_p2 = scmp.lt.s32.totalorder %s2112_s30, %s2112_s30 }
  0x61   :  { %p1845_p1 = scmp.ne.s32.totalorder %s2112_s30, %s1844_s20  ;;  %p1850_p3 = scmp.lt.s32.totalorder %s1844_s20, %s1844_s20 }
  0x63   :  { %p1851_p4 = por %p1850_p3, %p1849_p2 }
  0x65   :  { %p1852_p5 = pnand %p1851_p4, %p1845_p1 }
  0x67   :  { %1855 = shalt.err (!%p1852_p5)
}
  0x68   :  { %s1988_s0 = smov 256   ;;  %s1989_s27 = smov 16  }
  0x69   :  { %57 = dma.hbm_to_vmem [thread:$0]  %s2281_s2, 2048, %s2112_s30, [#allocation8], %s1988_s0, %s1988_s0, %s1989_s27  }
  0x6a   :  { %s1990_s11 = smov [#allocation12]   ;;  %s1991_s16 = smov [#allocation15]  }
  0x6b   :  { %s75_s3 = sshll.u32 %s1990_s11, 4  ;;  %s98_s12 = sshll.u32 %s1991_s16, 4  ;;  %s76_s3 = int_to_ptr.vmem [resolvable:$true] %s75_s3  ;;  %s99_s12 = int_to_ptr.vmem [resolvable:$true] %s98_s12 }
  0x6c   :  { %s1856_s17 = scalar_lea.hbm %s2283_s4, 6144 }
  0x6d   :  { %p1857_p6 = scmp.ne.s32.totalorder %s2283_s4, %s1856_s17  ;;  %p1860_p7 = scmp.lt.u32.totalorder %s1856_s17, %s2283_s4 }
  0x6f   :  { %p1862_p8 = pnand %p1860_p7, %p1857_p6 }
  0x71   :  { %1865 = shalt.err (!%p1862_p8)
}
  0x72   :  { %s1866_s2 = scalar_lea.vmem %s76_s3, 6144  ;;  %p1871_p10 = scmp.lt.s32.totalorder %s76_s3, %s76_s3 }
  0x73   :  { %p1867_p9 = scmp.ne.s32.totalorder %s76_s3, %s1866_s2  ;;  %p1872_p11 = scmp.lt.s32.totalorder %s1866_s2, %s1866_s2 }
  0x75   :  { %p1873_p12 = por %p1872_p11, %p1871_p10 }
  0x77   :  { %p1874_p13 = pnand %p1873_p12, %p1867_p9 }
  0x79   :  { %1877 = shalt.err (!%p1874_p13)
}
  0x7a   :  { %81 = dma.hbm_to_vmem [thread:$0]  %s2283_s4, 6144, %s76_s3, [#allocation11], %s1982_s25, %s1982_s25, %s1983_s26  }
  0x7b   :  { %s1878_s23 = scalar_lea.hbm %s2285_s6, 16 }
  0x7c   :  { %p1879_p0 = scmp.ne.s32.totalorder %s2285_s6, %s1878_s23  ;;  %p1882_p1 = scmp.lt.u32.totalorder %s1878_s23, %s2285_s6 }
  0x7e   :  { %p1884_p2 = pnand %p1882_p1, %p1879_p0 }
  0x80   :  { %1887 = shalt.err (!%p1884_p2)
}
  0x81   :  { %s1888_s27 = scalar_lea.vmem %s99_s12, 16  ;;  %s1892_s28 = scalar_lea.vmem %s99_s12, 32 }
  0x82   :  { %p1889_p3 = scmp.ne.s32.totalorder %s99_s12, %s1888_s27  ;;  %p1893_p4 = scmp.lt.s32.totalorder %s99_s12, %s99_s12 }
  0x83   :  { %p1894_p5 = scmp.lt.s32.totalorder %s1892_s28, %s1888_s27 }
  0x85   :  { %p1895_p6 = por %p1894_p5, %p1893_p4 }
  0x87   :  { %p1896_p7 = pnand %p1895_p6, %p1889_p3 }
  0x89   :  { %1899 = shalt.err (!%p1896_p7)
}
  0x8a   :  { %101 = dma.hbm_to_vmem [thread:$0]  %s2285_s6, 16, %s99_s12, [#allocation14]  }
  0x8b   :  { %s1992_s11 = smov [#allocation18]   ;;  %s1993_s16 = smov [#allocation19]  }
  0x8c   :  { %s117_s3 = sshll.u32 %s1992_s11, 4  ;;  %s129_s13 = sshll.u32 %s1993_s16, 4  ;;  %s118_s3 = int_to_ptr.vmem [resolvable:$true] %s117_s3  ;;  %s2173_s13 = int_to_ptr.vmem [resolvable:$true] %s129_s13 }
  0x8d   :  { %s1900_s7 = scalar_lea.hbm %s2287_s8, 2048 }
  0x8e   :  { %p1901_p8 = scmp.ne.s32.totalorder %s2287_s8, %s1900_s7  ;;  %p1904_p9 = scmp.lt.u32.totalorder %s1900_s7, %s2287_s8 }
  0x90   :  { %p1906_p10 = pnand %p1904_p9, %p1901_p8 }
  0x92   :  { %1909 = shalt.err (!%p1906_p10)
}
  0x93   :  { %s1910_s6 = scalar_lea.vmem %s118_s3, 2048  ;;  %p1915_p12 = scmp.lt.s32.totalorder %s118_s3, %s118_s3 }
  0x94   :  { %p1911_p11 = scmp.ne.s32.totalorder %s118_s3, %s1910_s6  ;;  %p1916_p13 = scmp.lt.s32.totalorder %s1910_s6, %s1910_s6 }
  0x96   :  { %p1917_p0 = por %p1916_p13, %p1915_p12 }
  0x98   :  { %p1918_p1 = pnand %p1917_p0, %p1911_p11 }
  0x9a   :  { %1921 = shalt.err (!%p1918_p1)
}
  0x9b   :  { %123 = dma.hbm_to_vmem [thread:$0]  %s2287_s8, 2048, %s118_s3, [#allocation17], %s1982_s25, %s1982_s25, %s1983_s26  }
  0x9c   :  { %s1922_s21 = scalar_lea.hbm %s2288_s9, 256 }
  0x9d   :  { %p1923_p2 = scmp.ne.s32.totalorder %s2288_s9, %s1922_s21  ;;  %p1926_p3 = scmp.lt.u32.totalorder %s1922_s21, %s2288_s9 }
  0x9f   :  { %p1928_p4 = pnand %p1926_p3, %p1923_p2 }
  0xa1   :  { %1931 = shalt.err (!%p1928_p4)
}
  0xa2   :  { %s1932_s0 = scalar_lea.vmem %s2173_s13, 256  ;;  %p1937_p6 = scmp.lt.s32.totalorder %s2173_s13, %s2173_s13 }
  0xa3   :  { %p1933_p5 = scmp.ne.s32.totalorder %s2173_s13, %s1932_s0  ;;  %p1938_p7 = scmp.lt.s32.totalorder %s1932_s0, %s1932_s0 }
  0xa5   :  { %p1939_p8 = por %p1938_p7, %p1937_p6 }
  0xa7   :  { %p1940_p9 = pnand %p1939_p8, %p1933_p5 }
  0xa9   :  { %1943 = shalt.err (!%p1940_p9)
}
  0xaa   :  { %135 = dma.hbm_to_vmem [thread:$0]  %s2288_s9, 256, %s2173_s13, [#allocation20], %s1982_s25, %s1982_s25, %s1983_s26  }
  0xab   :  { %1966 = dma.done.wait [#allocation5], 512  }
  0xac   :  { %1967 = vsyncadd [#allocation5], 4294966784 }
  0xad   :  { %1968 = dma.done.wait [#allocation8], 3072  }
  0xae   :  { %1969 = vsyncadd [#allocation8], 4294964224 }
  0xaf   :  { %1970 = dma.done.wait [#allocation11], 7168  }
  0xb0   :  { %1971 = vsyncadd [#allocation11], 4294960128 }
  0xb1   :  { %1972 = dma.done.wait [#allocation14], 32  }
  0xb2   :  { %1973 = vsyncadd [#allocation14], 4294967264 }
  0xb3   :  { %1974 = dma.done.wait [#allocation17], 2064  }
  0xb4   :  { %1975 = vsyncadd [#allocation17], 4294965232 }
  0xb5   :  { %1976 = dma.done.wait [#allocation20], 256  }
  0xb6   :  { %1977 = vsyncadd [#allocation20], 4294967040  ;;  %vm166_vm0 = vcmask 516096   ;;  %v1994_v0 = vmov 0.0   ;;  %v197_v1 = vld [vmem:[#allocation9 + $0x8] sm:$0xff]  ;;  %v199_v2 = vld [vmem:[#allocation9 + $0x18] sm:$0xff] }
  0xb7   :  { %288 = vmatprep.mubr.f32.mxu0 %v1994_v0  ;;  %171 = vst [vmem:[#allocation3] sm:$0x1] %v1994_v0  ;;  %172 = vst [vmem:[#allocation3 + $0x18] sm:$0x1] %v1994_v0  ;;  %v196_v3 = vld [vmem:[#allocation9] sm:$0xff]  ;;  %v1496_v4 = vpack.c.bf16 %v199_v2, %v197_v1  ;;  %v198_v5 = vld [vmem:[#allocation9 + $0x10] sm:$0xff] }
  0xb8   :  { %173 = vst [vmem:[#allocation3 + $0x11] sm:$0x1] %v1994_v0  ;;  %174 = vst [vmem:[#allocation3 + $0x29] sm:$0x1] %v1994_v0  ;;  %v201_v6 = vld [vmem:[#allocation9 + $0x28] sm:$0xff]  ;;  %v203_v7 = vld [vmem:[#allocation9 + $0x38] sm:$0xff]  ;;  %v1498_v8 = vpack.c.bf16 %v198_v5, %v196_v3 }
  0xb9   :  { %167 = vst.msk [vmem:[#allocation2] sm:$0x1] %vm166_vm0, %v1994_v0  ;;  %168 = vst.msk [vmem:[#allocation2 + $0x18] sm:$0x1] %vm166_vm0, %v1994_v0  ;;  %v1500_v9 = vpack.c.bf16 %v203_v7, %v201_v6  ;;  %v200_v10 = vld [vmem:[#allocation9 + $0x20] sm:$0xff]  ;;  %v202_v11 = vld [vmem:[#allocation9 + $0x30] sm:$0xff]  ;;  %1497 = vmatprep.subr.bf16.mxu0 %v1496_v4 }
  0xba   :  { %169 = vst.msk [vmem:[#allocation2 + $0x11] sm:$0x1] %vm166_vm0, %v1994_v0  ;;  %170 = vst.msk [vmem:[#allocation2 + $0x29] sm:$0x1] %vm166_vm0, %v1994_v0  ;;  %v205_v12 = vld [vmem:[#allocation9 + $0x48] sm:$0xff]  ;;  %v207_v13 = vld [vmem:[#allocation9 + $0x58] sm:$0xff]  ;;  %1499 = vmatpush1.bf16.msra.mxu0 %v1498_v8  ;;  %v1502_v14 = vpack.c.bf16 %v202_v11, %v200_v10 }
  0xbb   :  { %vm179_vm1 = vcmask 523264   ;;  %1501 = vmatprep.subr.bf16.mxu0 %v1500_v9  ;;  %v1504_v15 = vpack.c.bf16 %v207_v13, %v205_v12  ;;  %v204_v16 = vld [vmem:[#allocation9 + $0x40] sm:$0xff]  ;;  %v206_v17 = vld [vmem:[#allocation9 + $0x50] sm:$0xff]  ;;  %v209_v19 = vld [vmem:[#allocation9 + $0x68] sm:$0xff]  ;;  %vm1048_vm10 = vcmask 261120   ;;  %s1995_s9 = smov [#allocation21]  }
  0xbc   :  { %v175_v18 = vld [vmem:[#allocation4] sm:$0xff]  ;;  %v211_v20 = vld [vmem:[#allocation9 + $0x78] sm:$0xff]  ;;  %v176_v21 = vld [vmem:[#allocation4 + $0x8] sm:$0xff]  ;;  %v1506_v23 = vpack.c.bf16 %v206_v17, %v204_v16  ;;  %s1137_s28 = sshll.u32 %s1995_s9, 4  ;;  %s1138_s28 = int_to_ptr.vmem [resolvable:$true] %s1137_s28 }
  0xbd   :  { %180 = vst.msk [vmem:[#allocation2 + $0x1] sm:$0xff] %vm179_vm1, %v175_v18  ;;  %181 = vst.msk [vmem:[#allocation2 + $0x9] sm:$0xff] %vm179_vm1, %v176_v21  ;;  %v177_v22 = vld [vmem:[#allocation4 + $0x10] sm:$0xff]  ;;  %v178_v24 = vld [vmem:[#allocation4 + $0x18] sm:$0xff]  ;;  %v1508_v25 = vpack.c.bf16 %v211_v20, %v209_v19  ;;  %s1944_s4 = scalar_lea.vmem %s1138_s28, 256  ;;  %p1949_p11 = scmp.lt.s32.totalorder %s1138_s28, %s1138_s28 }
  0xbe   :  { %1503 = vmatpush1.bf16.msra.mxu0 %v1502_v14  ;;  %182 = vst.msk [vmem:[#allocation2 + $0x19] sm:$0xff] %vm179_vm1, %v177_v22  ;;  %v208_v26 = vld [vmem:[#allocation9 + $0x60] sm:$0xff]  ;;  %v210_v27 = vld [vmem:[#allocation9 + $0x70] sm:$0xff]  ;;  %183 = vst.msk [vmem:[#allocation2 + $0x21] sm:$0xff] %vm179_vm1, %v178_v24  ;;  %p1945_p10 = scmp.ne.s32.totalorder %s1138_s28, %s1944_s4  ;;  %p1950_p12 = scmp.lt.s32.totalorder %s1944_s4, %s1944_s4 }
  0xbf   :  { %1505 = vmatprep.subr.bf16.mxu0 %v1504_v15  ;;  %v313_v28 = vld [vmem:[#allocation7] sm:$0xff]  ;;  %v314_v29 = vld [vmem:[#allocation7 + $0x8] sm:$0xff]  ;;  %v1510_v30 = vpack.c.bf16 %v210_v27, %v208_v26  ;;  %v315_v32 = vld [vmem:[#allocation7 + $0x10] sm:$0xff] }
  0xc0   :  { %v1512_v31 = vpack.c.bf16 %v314_v29, %v313_v28  ;;  %v316_v33 = vld [vmem:[#allocation7 + $0x18] sm:$0xff]  ;;  %v317_v36 = vld [vmem:[#allocation7 + $0x20] sm:$0xff]  ;;  %v318_v37 = vld [vmem:[#allocation7 + $0x28] sm:$0xff]  ;;  %p1951_p13 = por %p1950_p12, %p1949_p11 }
  0xc1   :  { %v1516_v35 = vpack.c.bf16 %v316_v33, %v315_v32  ;;  %v1520_v39 = vpack.c.bf16 %v318_v37, %v317_v36  ;;  %v319_v40 = vld [vmem:[#allocation7 + $0x30] sm:$0xff]  ;;  %v320_v41 = vld [vmem:[#allocation7 + $0x38] sm:$0xff]  ;;  %v422_v44 = vld [vmem:[#allocation10] sm:$0xff] }
  0xc2   :  { %1507 = vmatpush1.bf16.msra.mxu0 %v1506_v23  ;;  %v1524_v43 = vpack.c.bf16 %v320_v41, %v319_v40  ;;  %v423_v45 = vld [vmem:[#allocation10 + $0x8] sm:$0xff]  ;;  %v424_v49 = vld [vmem:[#allocation10 + $0x10] sm:$0xff]  ;;  %v425_v50 = vld [vmem:[#allocation10 + $0x18] sm:$0xff]  ;;  %p1952_p0 = pnand %p1951_p13, %p1945_p10 }
  0xc3   :  { %1509 = vmatprep.subr.bf16.mxu0 %v1508_v25  ;;  %v1528_v48 = vpack.c.bf16 %v423_v45, %v422_v44  ;;  %v1532_v53 = vpack.c.bf16 %v425_v50, %v424_v49  ;;  %v426_v54 = vld [vmem:[#allocation10 + $0x20] sm:$0xff]  ;;  %v427_v55 = vld [vmem:[#allocation10 + $0x28] sm:$0xff]  ;;  %v428_v59 = vld [vmem:[#allocation10 + $0x30] sm:$0xff] }
  0xc4   :  { %v188_v34 = vld [vmem:[#allocation2 + $0x1] sm:$0xff]  ;;  %v189_v38 = vld [vmem:[#allocation2 + $0x9] sm:$0xff]  ;;  %v1536_v57 = vpack.c.bf16 %v427_v55, %v426_v54  ;;  %v429_v60 = vld [vmem:[#allocation10 + $0x38] sm:$0xff] }
  0xc5   :  { %v190_v42 = vld [vmem:[#allocation2 + $0x19] sm:$0xff]  ;;  %v191_v46 = vld [vmem:[#allocation2 + $0x21] sm:$0xff]  ;;  %v1540_v61 = vpack.c.bf16 %v429_v60, %v428_v59  ;;  %v193_v62 = vld [vmem:[#allocation2 + $0xa] sm:$0xff] }
  0xc6   :  { %1511 = vmatpush1.bf16.msra.mxu0 %v1510_v30  ;;  %v184_v47 = vld [vmem:[#allocation2] sm:$0xff]  ;;  %v185_v51 = vld [vmem:[#allocation2 + $0x8] sm:$0xff]  ;;  %v186_v52 = vld [vmem:[#allocation2 + $0x18] sm:$0xff] }
  0xc7   :  { %1513 = vmatprep.subr.bf16.mxu0 %v1512_v31  ;;  %v187_v56 = vld [vmem:[#allocation2 + $0x20] sm:$0xff]  ;;  %v587_v2 = vld [vmem:[#allocation12 + $0x8] sm:$0xff]  ;;  %v588_v4 = vld [vmem:[#allocation12 + $0x10] sm:$0xff] }
  0xc8   :  { %v192_v58 = vld [vmem:[#allocation2 + $0x2] sm:$0xff]  ;;  %v194_v63 = vld [vmem:[#allocation2 + $0x1a] sm:$0xff]  ;;  %v592_v10 = vld [vmem:[#allocation12 + $0x30] sm:$0xff] }
  0xc9   :  { %1154 = vmatmul.mubr.msk.f32.vlgmr.msra.gmra.mrb[0].mxu0 %vm179_vm1, %v188_v34  ;;  %v586_v1 = vld [vmem:[#allocation12] sm:$0xff]  ;;  %v589_v5 = vld [vmem:[#allocation12 + $0x18] sm:$0xff]  ;;  %v591_v8 = vld [vmem:[#allocation12 + $0x28] sm:$0xff] }
  0xca   :  { %1515 = vmatpush3.bf16.msra.mxu0 %v1512_v31  ;;  %294 = vmatprep.mubr.f32.mxu0 %v1994_v0  ;;  %v1544_v3 = vpack.c.bf16 %v587_v2, %v586_v1  ;;  %v1548_v6 = vpack.c.bf16 %v589_v5, %v588_v4  ;;  %v590_v7 = vld [vmem:[#allocation12 + $0x20] sm:$0xff]  ;;  %v593_v11 = vld [vmem:[#allocation12 + $0x38] sm:$0xff]  ;;  %v595_v14 = vld [vmem:[#allocation12 + $0x48] sm:$0xff] }
  0xcb   :  { %1517 = vmatprep.subr.bf16.mxu0 %v1516_v35  ;;  %v1552_v9 = vpack.c.bf16 %v591_v8, %v590_v7  ;;  %v1556_v12 = vpack.c.bf16 %v593_v11, %v592_v10  ;;  %v594_v13 = vld [vmem:[#allocation12 + $0x40] sm:$0xff]  ;;  %v596_v16 = vld [vmem:[#allocation12 + $0x50] sm:$0xff]  ;;  %v597_v17 = vld [vmem:[#allocation12 + $0x58] sm:$0xff] }
  0xcc   :  { %1545 = vmatprep.subr.bf16.mxu1 %v1544_v3  ;;  %v1560_v15 = vpack.c.bf16 %v595_v14, %v594_v13  ;;  %v1564_v18 = vpack.c.bf16 %v597_v17, %v596_v16  ;;  %v598_v19 = vld [vmem:[#allocation12 + $0x60] sm:$0xff]  ;;  %v599_v20 = vld [vmem:[#allocation12 + $0x68] sm:$0xff]  ;;  %v600_v22 = vld [vmem:[#allocation12 + $0x70] sm:$0xff] }
  0xcd   :  { %1155 = vmatmul.mubr.msk.f32.gmra.mrb[2].mxu0 %vm179_vm1, %v189_v38  ;;  %1547 = vmatpush3.bf16.msra.mxu1 %v1544_v3  ;;  %v1568_v21 = vpack.c.bf16 %v599_v20, %v598_v19  ;;  %v601_v23 = vld [vmem:[#allocation12 + $0x78] sm:$0xff]  ;;  %v702_v25 = vld [vmem:[#allocation12 + $0x80] sm:$0xff]  ;;  %v703_v26 = vld [vmem:[#allocation12 + $0x88] sm:$0xff] }
  0xce   :  { %1519 = vmatpush3.bf16.msra.mxu0 %v1516_v35  ;;  %300 = vmatprep.mubr.f32.mxu0 %v1994_v0  ;;  %v1572_v24 = vpack.c.bf16 %v601_v23, %v600_v22  ;;  %v2238_v27 = vpack.c.bf16 %v703_v26, %v702_v25  ;;  %v945_v32 = vld [vmem:[#allocation18] sm:$0xff]  ;;  %v946_v33 = vld [vmem:[#allocation18 + $0x8] sm:$0xff]  ;;  %v947_v34 = vld [vmem:[#allocation18 + $0x10] sm:$0xff] }
  0xcf   :  { %1521 = vmatprep.subr.bf16.mxu0 %v1520_v39  ;;  %1549 = vmatprep.subr.bf16.mxu1 %v1548_v6  ;;  %v1640_v35 = vpack.c.bf16 %v946_v33, %v945_v32  ;;  %v948_v36 = vld [vmem:[#allocation18 + $0x18] sm:$0xff]  ;;  %v704_v19 = vld [vmem:[#allocation12 + $0x90] sm:$0xff]  ;;  %v707_v25 = vld [vmem:[#allocation12 + $0xa8] sm:$0xff] }
  0xd0   :  { %v1644_v37 = vpack.c.bf16 %v948_v36, %v947_v34  ;;  %v705_v20 = vld [vmem:[#allocation12 + $0x98] sm:$0xff]  ;;  %v708_v32 = vld [vmem:[#allocation12 + $0xb0] sm:$0xff]  ;;  %v711_v36 = vld [vmem:[#allocation12 + $0xc8] sm:$0xff] }
  0xd1   :  { %1156 = vmatmul.mubr.msk.f32.gmra.mrb[4].mxu0 %vm179_vm1, %v190_v42  ;;  %1551 = vmatpush3.bf16.msra.mxu1 %v1548_v6  ;;  %v1580_v23 = vpack.c.bf16 %v705_v20, %v704_v19  ;;  %v709_v33 = vld [vmem:[#allocation12 + $0xb8] sm:$0xff]  ;;  %v954_v19 = vld [vmem:[#allocation18 + $0x48] sm:$0xff] }
  0xd2   :  { %1523 = vmatpush3.bf16.msra.mxu0 %v1520_v39  ;;  %306 = vmatprep.mubr.f32.mxu0 %v1994_v0  ;;  %v195_v0 = vld [vmem:[#allocation2 + $0x22] sm:$0xff]  ;;  %v1588_v34 = vpack.c.bf16 %v709_v33, %v708_v32 }
  0xd3   :  { %1525 = vmatprep.subr.bf16.mxu0 %v1524_v43  ;;  %1553 = vmatprep.subr.bf16.mxu1 %v1552_v9  ;;  %v1172_v33 = vld [vmem:[#allocation15] ss:$0 sm:$0xff] }
  0xd5   :  { %1157 = vmatmul.mubr.msk.f32.gmra.mrb[6].mxu0 %vm179_vm1, %v191_v46  ;;  %1555 = vmatpush3.bf16.msra.mxu1 %v1552_v9 }
  0xd6   :  { %1527 = vmatpush3.bf16.msra.mxu0 %v1524_v43  ;;  %1305 = vmatprep.mubr.msk.f32.mxu0 %vm179_vm1, %v184_v47 }
  0xd7   :  { %1529 = vmatprep.subr.bf16.mxu0 %v1528_v48  ;;  %1557 = vmatprep.subr.bf16.mxu1 %v1556_v12 }
  0xd9   :  { %1306 = vmatmul.mubr.msk.f32.vlgmr.msra.gmra.mrb[8].mxu0 %vm179_vm1, %v185_v51  ;;  %1559 = vmatpush3.bf16.msra.mxu1 %v1556_v12  ;;  %v1166_v51 = vld [vmem:[#allocation13] ss:$0 sm:$0xff] }
  0xda   :  { %1531 = vmatpush3.bf16.msra.mxu0 %v1528_v48  ;;  %1308 = vmatprep.mubr.msk.f32.mxu0 %vm179_vm1, %v186_v52 }
  0xdb   :  { %1533 = vmatprep.subr.bf16.mxu0 %v1532_v53  ;;  %1561 = vmatprep.subr.bf16.mxu1 %v1560_v15 }
  0xdd   :  { %1309 = vmatmul.mubr.msk.f32.gmra.mrb[10].mxu0 %vm179_vm1, %v187_v56  ;;  %1563 = vmatpush3.bf16.msra.mxu1 %v1560_v15 }
  0xde   :  { %1535 = vmatpush3.bf16.msra.mxu0 %v1532_v53  ;;  %1327 = vmatprep.mubr.msk.f32.mxu0 %vm179_vm1, %v192_v58 }
  0xdf   :  { %1537 = vmatprep.subr.bf16.mxu0 %v1536_v57  ;;  %1565 = vmatprep.subr.bf16.mxu1 %v1564_v18 }
  0xe1   :  { %1567 = vmatpush3.bf16.msra.mxu1 %v1564_v18 }
  0xe2   :  { %1539 = vmatpush3.bf16.msra.mxu0 %v1536_v57  ;;  %1569 = vmatprep.subr.bf16.mxu1 %v1568_v21 }
  0xe3   :  { %1541 = vmatprep.subr.bf16.mxu0 %v1540_v61 }
  0xe5   :  { %1571 = vmatpush3.bf16.msra.mxu1 %v1568_v21 }
  0xe6   :  { %1543 = vmatpush3.bf16.msra.mxu0 %v1540_v61  ;;  %1573 = vmatprep.subr.bf16.mxu1 %v1572_v24 }
  0xe7   :  { %1641 = vmatprep.subr.bf16.mxu0 %v1640_v35 }
  0xe9   :  { %1328 = vmatmul.mubr.msk.f32.vlgmr.msra.gmra.mrb[12].mxu0 %vm179_vm1, %v193_v62  ;;  %1575 = vmatpush3.bf16.msra.mxu1 %v1572_v24  ;;  %v706_v24 = vld [vmem:[#allocation12 + $0xa0] sm:$0xff] }
  0xea   :  { %1330 = vmatprep.mubr.msk.f32.mxu0 %vm179_vm1, %v194_v63  ;;  %1577 = vmatprep.subr.bf16.mxu1 %v2238_v27 }
  0xeb   :  { %1643 = vmatpush3.bf16.msra.mxu0 %v1640_v35  ;;  %v710_v35 = vld [vmem:[#allocation12 + $0xc0] sm:$0xff] }
  0xec   :  { %1645 = vmatprep.subr.bf16.mxu0 %v1644_v37 }
  0xed   :  { %1331 = vmatmul.mubr.msk.f32.gmra.mrb[14].mxu0 %vm179_vm1, %v195_v0 }
  0xef   :  { %1647 = vmatpush3.bf16.msra.mxu0 %v1644_v37  ;;  %v1592_v37 = vpack.c.bf16 %v711_v36, %v710_v35 }
 0x19c   :  { %v290_v28 = vpop.f32.mrb[0].mxu0 }
 0x19d   :  { %v2241_v29 = vpop.f32.mrb[1].mxu0 }
 0x1a0   :  { %v296_v30 = vpop.f32.mrb[2].mxu0 }
 0x1a1   :  { %v2243_v31 = vpop.f32.mrb[3].mxu0 }
 0x1a4   :  { %v302_v38 = vpop.f32.mrb[4].mxu0 }
 0x1a5   :  { %v2245_v39 = vpop.f32.mrb[5].mxu0 }
 0x1a8   :  { %v308_v40 = vpop.f32.mrb[6].mxu0 }
 0x1a9   :  { %v2247_v41 = vpop.f32.mrb[7].mxu0 }
 0x1ac   :  { %v1307_v42 = vpop.f32.mrb[8].mxu0 }
 0x1ad   :  { %v419_v43 = vadd.f32 %v1307_v42, %v296_v30  ;;  %v399_v44 = vpop.f32.mrb[9].mxu0  ;;  %v1584_v30 = vpack.c.bf16 %v707_v25, %v706_v24  ;;  %v714_v42 = vld [vmem:[#allocation12 + $0xe0] sm:$0xff]  ;;  %v958_v25 = vld [vmem:[#allocation18 + $0x68] sm:$0xff] }
 0x1ae   :  { %v418_v45 = vadd.f32 %v399_v44, %v290_v28  ;;  %v957_v24 = vld [vmem:[#allocation18 + $0x60] sm:$0xff] }
 0x1b0   :  { %v1310_v46 = vpop.f32.mrb[10].mxu0 }
 0x1b1   :  { %v421_v47 = vadd.f32 %v1310_v46, %v308_v40  ;;  %v409_v48 = vpop.f32.mrb[11].mxu0  ;;  %v713_v40 = vld [vmem:[#allocation12 + $0xd8] sm:$0xff] }
 0x1b2   :  { %v420_v49 = vadd.f32 %v409_v48, %v302_v38  ;;  %v712_v38 = vld [vmem:[#allocation12 + $0xd0] sm:$0xff]  ;;  %v717_v46 = vld [vmem:[#allocation12 + $0xf8] sm:$0xff]  ;;  %v812_v48 = vld [vmem:[#allocation12 + $0x100] sm:$0xff] }
 0x1bc   :  { %v1329_v50 = vpop.f32.mrb[12].mxu0 }
 0x1bd   :  { %v528_v52 = vadd.f32 %v1329_v50, %v419_v43  ;;  %v508_v53 = vpop.f32.mrb[13].mxu0  ;;  %v715_v43 = vld [vmem:[#allocation12 + $0xe8] sm:$0xff] }
 0x1be   :  { %v527_v54 = vadd.f32 %v508_v53, %v418_v45  ;;  %v1600_v44 = vpack.c.bf16 %v715_v43, %v714_v42  ;;  %v716_v45 = vld [vmem:[#allocation12 + $0xf0] sm:$0xff] }
 0x1bf   :  { %v539_v55 = vadd.f32 %v1166_v51, %v528_v52  ;;  %v815_v52 = vld [vmem:[#allocation12 + $0x118] sm:$0xff] }
 0x1c0   :  { %v538_v56 = vadd.f32 %v1166_v51, %v527_v54  ;;  %v1332_v57 = vpop.f32.mrb[14].mxu0  ;;  %v816_v54 = vld [vmem:[#allocation12 + $0x120] sm:$0xff] }
 0x1c1   :  { %v558_v58 = vmin.f32 %v539_v55, 0.0  ;;  %v530_v59 = vadd.f32 %v1332_v57, %v421_v47  ;;  %v518_v60 = vpop.f32.mrb[15].mxu0  ;;  %vm554_vm2 = vcmp.gt.f32.partialorder %v539_v55, 0.0  ;;  %v1604_v47 = vpack.c.bf16 %v717_v46, %v716_v45  ;;  %v818_v57 = vld [vmem:[#allocation12 + $0x130] sm:$0xff] }
 0x1c2   :  { %v557_v61 = vmin.f32 %v538_v56, 0.0  ;;  %v529_v62 = vadd.f32 %v518_v60, %v420_v49  ;;  %vm553_vm3 = vcmp.gt.f32.partialorder %v538_v56, 0.0  ;;  %v813_v49 = vld [vmem:[#allocation12 + $0x108] sm:$0xff] }
 0x1c3   :  { %v563_v63 = vmul.f32 1.442695, %v558_v58  ;;  %v541_v0 = vadd.f32 %v1166_v51, %v530_v59  ;;  %v1608_v50 = vpack.c.bf16 %v813_v49, %v812_v48  ;;  %v819_v58 = vld [vmem:[#allocation12 + $0x138] sm:$0xff] }
 0x1c4   :  { %v561_v1 = vmul.f32 1.442695, %v557_v61  ;;  %v540_v2 = vadd.f32 %v1166_v51, %v529_v62  ;;  %v814_v51 = vld [vmem:[#allocation12 + $0x110] sm:$0xff]  ;;  %v1620_v60 = vpack.c.bf16 %v819_v58, %v818_v57  ;;  %v820_v61 = vld [vmem:[#allocation12 + $0x140] sm:$0xff]  ;;  %v821_v62 = vld [vmem:[#allocation12 + $0x148] sm:$0xff] }
 0x1c5   :  { %1708 = vpow2.f32 %v563_v63  ;;  %v560_v3 = vmin.f32 %v541_v0, 0.0  ;;  %vm556_vm4 = vcmp.gt.f32.partialorder %v541_v0, 0.0  ;;  %v1612_v53 = vpack.c.bf16 %v815_v52, %v814_v51  ;;  %v1167_v52 = vld [vmem:[#allocation16] ss:$0 sm:$0xff] }
 0x1c6   :  { %1710 = vpow2.f32 %v561_v1  ;;  %v559_v4 = vmin.f32 %v540_v2, 0.0  ;;  %vm555_vm5 = vcmp.gt.f32.partialorder %v540_v2, 0.0  ;;  %v1624_v63 = vpack.c.bf16 %v821_v62, %v820_v61  ;;  %v823_v1 = vld [vmem:[#allocation12 + $0x158] sm:$0xff] }
 0x1c7   :  { %v567_v5 = vmul.f32 1.442695, %v560_v3  ;;  %v824_v3 = vld [vmem:[#allocation12 + $0x160] sm:$0xff]  ;;  %v549_v57 = vadd.f32 %v1167_v52, %v2241_v29 }
 0x1c8   :  { %v565_v6 = vmul.f32 1.442695, %v559_v4  ;;  %v825_v4 = vld [vmem:[#allocation12 + $0x168] sm:$0xff] }
 0x1c9   :  { %1712 = vpow2.f32 %v567_v5  ;;  %v1632_v5 = vpack.c.bf16 %v825_v4, %v824_v3  ;;  %v551_v3 = vadd.f32 %v1167_v52, %v2245_v39 }
 0x1ca   :  { %1714 = vpow2.f32 %v565_v6  ;;  %v826_v6 = vld [vmem:[#allocation12 + $0x170] sm:$0xff] }
 0x1cf   :  { %v1709_v7 = vpop.eup %1708 }
 0x1d0   :  { %v1711_v8 = vpop.eup %1710  ;;  %v1169_v9 = vadd.f32 -1.0, %v1709_v7  ;;  %v827_v7 = vld [vmem:[#allocation12 + $0x178] sm:$0xff] }
 0x1d1   :  { %v1168_v10 = vadd.f32 -1.0, %v1711_v8  ;;  %v1636_v8 = vpack.c.bf16 %v827_v7, %v826_v6  ;;  %v1046_v6 = vld [vmem:[#allocation19] sm:$0xff] }
 0x1d2   :  { %v2249_v11 = vsel %vm554_vm2, %v539_v55, %v1169_v9  ;;  %v817_v55 = vld [vmem:[#allocation12 + $0x128] sm:$0xff] }
 0x1d3   :  { %v1713_v12 = vpop.eup %1712  ;;  %578 = vst [vmem:[#allocation3 + $0x9] sm:$0xff] %v2249_v11  ;;  %v573_v13 = vsel %vm553_vm3, %v538_v56, %v1168_v10  ;;  %v1616_v56 = vpack.c.bf16 %v817_v55, %v816_v54  ;;  %v550_v55 = vadd.f32 %v1167_v52, %v2243_v31 }
 0x1d4   :  { %v1715_v14 = vpop.eup %1714  ;;  %577 = vst [vmem:[#allocation3 + $0x1] sm:$0xff] %v573_v13  ;;  %v1171_v15 = vadd.f32 -1.0, %v1713_v12  ;;  %v949_v12 = vld [vmem:[#allocation18 + $0x20] sm:$0xff] }
 0x1d5   :  { %v1170_v16 = vadd.f32 -1.0, %v1715_v14 }
 0x1d6   :  { %v2252_v17 = vsel %vm556_vm4, %v541_v0, %v1171_v15  ;;  %v822_v0 = vld [vmem:[#allocation12 + $0x150] sm:$0xff] }
 0x1d7   :  { %580 = vst [vmem:[#allocation3 + $0x21] sm:$0xff] %v2252_v17  ;;  %v575_v18 = vsel %vm555_vm5, %v540_v2, %v1170_v16  ;;  %v1628_v2 = vpack.c.bf16 %v823_v1, %v822_v0  ;;  %v951_v15 = vld [vmem:[#allocation18 + $0x30] sm:$0xff]  ;;  %v952_v16 = vld [vmem:[#allocation18 + $0x38] sm:$0xff]  ;;  %v552_v1 = vadd.f32 %v1167_v52, %v2247_v41 }
 0x1d8   :  { %579 = vst [vmem:[#allocation3 + $0x19] sm:$0xff] %v575_v18 }
 0x1da   :  { %v808_v9 = vld [vmem:[#allocation3 + $0xa] sm:$0xff] }
 0x1db   :  { %v582_v21 = vld [vmem:[#allocation3] sm:$0xff]  ;;  %v583_v22 = vld [vmem:[#allocation3 + $0x8] sm:$0xff] }
 0x1dc   :  { %1365 = vmatprep.mubr.f32.mxu1 %v582_v21  ;;  %v807_v59 = vld [vmem:[#allocation3 + $0x2] sm:$0xff] }
 0x1dd   :  { %1366 = vmatmul.mubr.f32.vlgmr.msra.gmra.mrb[0].mxu1 %v583_v22  ;;  %v955_v21 = vld [vmem:[#allocation18 + $0x50] sm:$0xff]  ;;  %v956_v22 = vld [vmem:[#allocation18 + $0x58] sm:$0xff] }
 0x1de   :  { %1579 = vmatpush3.bf16.msra.mxu1 %v2238_v27  ;;  %v1596_v27 = vpack.c.bf16 %v713_v40, %v712_v38 }
 0x1df   :  { %v584_v26 = vld [vmem:[#allocation3 + $0x18] sm:$0xff]  ;;  %1581 = vmatprep.subr.bf16.mxu1 %v1580_v23  ;;  %v585_v28 = vld [vmem:[#allocation3 + $0x20] sm:$0xff] }
 0x1e0   :  { %1368 = vmatprep.mubr.f32.mxu1 %v584_v26  ;;  %v809_v10 = vld [vmem:[#allocation3 + $0x1a] sm:$0xff]  ;;  %v1664_v26 = vpack.c.bf16 %v958_v25, %v957_v24 }
 0x1e1   :  { %1369 = vmatmul.mubr.f32.gmra.mrb[2].mxu1 %v585_v28  ;;  %v959_v28 = vld [vmem:[#allocation18 + $0x70] sm:$0xff] }
 0x1e2   :  { %1583 = vmatpush3.bf16.msra.mxu1 %v1580_v23  ;;  %1403 = vmatprep.mubr.f32.mxu1 %v573_v13  ;;  %v950_v13 = vld [vmem:[#allocation18 + $0x28] sm:$0xff]  ;;  %v1660_v23 = vpack.c.bf16 %v956_v22, %v955_v21 }
 0x1e3   :  { %1585 = vmatprep.subr.bf16.mxu1 %v1584_v30  ;;  %v1648_v14 = vpack.c.bf16 %v950_v13, %v949_v12 }
 0x1e5   :  { %1649 = vmatprep.subr.bf16.mxu0 %v1648_v14 }
 0x1e6   :  { %1587 = vmatpush3.bf16.msra.mxu1 %v1584_v30  ;;  %1651 = vmatpush3.bf16.msra.mxu0 %v1648_v14  ;;  %v960_v30 = vld [vmem:[#allocation18 + $0x78] sm:$0xff] }
 0x1e7   :  { %1589 = vmatprep.subr.bf16.mxu1 %v1588_v34  ;;  %v1668_v32 = vpack.c.bf16 %v960_v30, %v959_v28 }
 0x1ea   :  { %1591 = vmatpush3.bf16.msra.mxu1 %v1588_v34 }
 0x1eb   :  { %1593 = vmatprep.subr.bf16.mxu1 %v1592_v37 }
 0x1ee   :  { %1595 = vmatpush3.bf16.msra.mxu1 %v1592_v37 }
 0x1ef   :  { %1597 = vmatprep.subr.bf16.mxu1 %v1596_v27 }
 0x1f2   :  { %1599 = vmatpush3.bf16.msra.mxu1 %v1596_v27 }
 0x1f3   :  { %1601 = vmatprep.subr.bf16.mxu1 %v1600_v44 }
 0x1f6   :  { %1603 = vmatpush3.bf16.msra.mxu1 %v1600_v44 }
 0x1f7   :  { %1605 = vmatprep.subr.bf16.mxu1 %v1604_v47 }
 0x1fa   :  { %1607 = vmatpush3.bf16.msra.mxu1 %v1604_v47 }
 0x1fb   :  { %1609 = vmatprep.subr.bf16.mxu1 %v1608_v50 }
 0x1fd   :  { %1404 = vmatmul.mubr.f32.vlgmr.msra.gmra.mrb[0].mxu1 %v2249_v11  ;;  %v810_v11 = vld [vmem:[#allocation3 + $0x22] sm:$0xff] }
 0x1fe   :  { %1406 = vmatprep.mubr.f32.mxu1 %v575_v18  ;;  %1611 = vmatpush3.bf16.msra.mxu1 %v1608_v50  ;;  %v953_v18 = vld [vmem:[#allocation18 + $0x40] sm:$0xff] }
 0x1ff   :  { %1613 = vmatprep.subr.bf16.mxu1 %v1612_v53  ;;  %v1656_v20 = vpack.c.bf16 %v954_v19, %v953_v18 }
 0x201   :  { %1407 = vmatmul.mubr.f32.gmra.mrb[2].mxu1 %v2252_v17  ;;  %v1652_v17 = vpack.c.bf16 %v952_v16, %v951_v15 }
 0x202   :  { %1615 = vmatpush3.bf16.msra.mxu1 %v1612_v53  ;;  %1441 = vmatprep.mubr.f32.mxu1 %v807_v59 }
 0x203   :  { %1617 = vmatprep.subr.bf16.mxu1 %v1616_v56  ;;  %1653 = vmatprep.subr.bf16.mxu0 %v1652_v17 }
 0x204   :  { %1655 = vmatpush3.bf16.msra.mxu0 %v1652_v17 }
 0x205   :  { %1657 = vmatprep.subr.bf16.mxu0 %v1656_v20 }
 0x206   :  { %1619 = vmatpush3.bf16.msra.mxu1 %v1616_v56 }
 0x207   :  { %1621 = vmatprep.subr.bf16.mxu1 %v1620_v60 }
 0x208   :  { %1659 = vmatpush3.bf16.msra.mxu0 %v1656_v20 }
 0x209   :  { %1661 = vmatprep.subr.bf16.mxu0 %v1660_v23 }
 0x20a   :  { %1623 = vmatpush3.bf16.msra.mxu1 %v1620_v60 }
 0x20b   :  { %1625 = vmatprep.subr.bf16.mxu1 %v1624_v63 }
 0x20c   :  { %1663 = vmatpush3.bf16.msra.mxu0 %v1660_v23 }
 0x20d   :  { %1665 = vmatprep.subr.bf16.mxu0 %v1664_v26 }
 0x20e   :  { %1627 = vmatpush3.bf16.msra.mxu1 %v1624_v63 }
 0x20f   :  { %1629 = vmatprep.subr.bf16.mxu1 %v1628_v2 }
 0x210   :  { %1667 = vmatpush3.bf16.msra.mxu0 %v1664_v26 }
 0x211   :  { %1669 = vmatprep.subr.bf16.mxu0 %v1668_v32 }
 0x212   :  { %1631 = vmatpush3.bf16.msra.mxu1 %v1628_v2 }
 0x213   :  { %1633 = vmatprep.subr.bf16.mxu1 %v1632_v5 }
 0x214   :  { %1671 = vmatpush3.bf16.msra.mxu0 %v1668_v32 }
 0x216   :  { %1635 = vmatpush3.bf16.msra.mxu1 %v1632_v5 }
 0x217   :  { %1637 = vmatprep.subr.bf16.mxu1 %v1636_v8 }
 0x21a   :  { %1639 = vmatpush3.bf16.msra.mxu1 %v1636_v8 }
 0x21d   :  { %1442 = vmatmul.mubr.f32.vlgmr.msra.gmra.mrb[0].mxu1 %v808_v9 }
 0x21e   :  { %1444 = vmatprep.mubr.f32.mxu1 %v809_v10 }
 0x221   :  { %1445 = vmatmul.mubr.f32.gmra.mrb[2].mxu1 %v810_v11  ;;  %v1047_v11 = vld [vmem:[#allocation19 + $0x8] sm:$0xff] }
 0x2f0   :  { %v1443_v34 = vpop.f32.mrb[0].mxu1 }
 0x2f1   :  { %v1680_v35 = vadd.f32 %v1443_v34, %v1172_v33  ;;  %v894_v36 = vpop.f32.mrb[1].mxu1 }
 0x2f2   :  { %v1681_v37 = vadd.f32 %v1172_v33, %v894_v36 }
 0x2f3   :  { %v922_v38 = vmin.f32 %v1680_v35, 0.0  ;;  %vm918_vm6 = vcmp.gt.f32.partialorder %v1680_v35, 0.0 }
 0x2f4   :  { %v921_v40 = vmin.f32 %v1681_v37, 0.0  ;;  %v1446_v27 = vpop.f32.mrb[2].mxu1  ;;  %vm917_vm7 = vcmp.gt.f32.partialorder %v1681_v37, 0.0 }
 0x2f5   :  { %v927_v42 = vmul.f32 1.442695, %v922_v38  ;;  %v1682_v43 = vadd.f32 %v1446_v27, %v1172_v33  ;;  %v904_v44 = vpop.f32.mrb[3].mxu1 }
 0x2f6   :  { %v925_v45 = vmul.f32 1.442695, %v921_v40  ;;  %v1683_v46 = vadd.f32 %v1172_v33, %v904_v44 }
 0x2f7   :  { %1716 = vpow2.f32 %v927_v42  ;;  %v924_v47 = vmin.f32 %v1682_v43, 0.0  ;;  %vm920_vm8 = vcmp.gt.f32.partialorder %v1682_v43, 0.0 }
 0x2f8   :  { %1718 = vpow2.f32 %v925_v45  ;;  %v923_v48 = vmin.f32 %v1683_v46, 0.0  ;;  %vm919_vm9 = vcmp.gt.f32.partialorder %v1683_v46, 0.0 }
 0x2f9   :  { %v931_v49 = vmul.f32 1.442695, %v924_v47 }
 0x2fa   :  { %v929_v50 = vmul.f32 1.442695, %v923_v48 }
 0x2fb   :  { %1720 = vpow2.f32 %v931_v49 }
 0x2fc   :  { %1722 = vpow2.f32 %v929_v50 }
 0x301   :  { %v1717_v51 = vpop.eup %1716 }
 0x302   :  { %v1719_v53 = vpop.eup %1718  ;;  %v1174_v54 = vadd.f32 -1.0, %v1717_v51 }
 0x303   :  { %v1173_v56 = vadd.f32 -1.0, %v1719_v53 }
 0x304   :  { %v938_v58 = vsel %vm918_vm6, %v1680_v35, %v1174_v54 }
 0x305   :  { %v1721_v59 = vpop.eup %1720  ;;  %v942_v60 = vadd.f32 %v938_v58, %v550_v55  ;;  %v937_v61 = vsel %vm917_vm7, %v1681_v37, %v1173_v56 }
 0x306   :  { %v1723_v62 = vpop.eup %1722  ;;  %v1176_v63 = vadd.f32 -1.0, %v1721_v59  ;;  %v941_v0 = vadd.f32 %v937_v61, %v549_v57 }
 0x307   :  { %v1175_v2 = vadd.f32 -1.0, %v1723_v62 }
 0x308   :  { %1479 = vmatprep.mubr.f32.mxu0 %v941_v0  ;;  %v940_v31 = vsel %vm920_vm8, %v1682_v43, %v1176_v63 }
 0x309   :  { %1480 = vmatmul.mubr.f32.vlgmr.msra.gmra.mrb[16].mxu0 %v942_v60  ;;  %v939_v4 = vsel %vm919_vm9, %v1683_v46, %v1175_v2  ;;  %v944_v29 = vadd.f32 %v940_v31, %v552_v1 }
 0x30a   :  { %v943_v5 = vadd.f32 %v939_v4, %v551_v3 }
 0x30c   :  { %1482 = vmatprep.mubr.f32.mxu0 %v943_v5 }
 0x30d   :  { %1483 = vmatmul.mubr.f32.gmra.mrb[18].mxu0 %v944_v29 }
 0x30e   :  { %1493 = vmatprep.mubr.msk.f32.mxu0 %vm1048_vm10, %v1046_v6 }
 0x3dc   :  { %v1481_v7 = vpop.f32.mrb[16].mxu0 }
 0x3dd   :  { %v1027_v8 = vpop.f32.mrb[17].mxu0 }
 0x3de   :  { %v1672_v9 = vpack.c.bf16 %v1481_v7, %v1027_v8 }
 0x3e0   :  { %v1484_v41 = vpop.f32.mrb[18].mxu0  ;;  %1673 = vmatprep.subr.bf16.mxu0 %v1672_v9 }
 0x3e1   :  { %v1037_v10 = vpop.f32.mrb[19].mxu0  ;;  %1675 = vmatpush3.bf16.msra.mxu0 %v1672_v9 }
 0x3e2   :  { %v1676_v39 = vpack.c.bf16 %v1484_v41, %v1037_v10 }
 0x3e4   :  { %1677 = vmatprep.subr.bf16.mxu0 %v1676_v39 }
 0x3e5   :  { %1679 = vmatpush3.bf16.msra.mxu0 %v1676_v39 }
 0x3e8   :  { %1494 = vmatmul.mubr.msk.f32.vlgmr.msra.gmra.mrb[20].mxu0 %vm1048_vm10, %v1047_v11 }
 0x4bb   :  { %v1495_v12 = vpop.f32.mrb[20].mxu0 }
 0x4bc   :  { %1131 = vst.msk [vmem:[#allocation21 + $0x8] sm:$0xff] %vm179_vm1, %v1495_v12  ;;  %v1121_v13 = vpop.f32.mrb[21].mxu0 }
 0x4bd   :  { %1130 = vst.msk [vmem:[#allocation21] sm:$0xff] %vm179_vm1, %v1121_v13 }
 0x4be   :  { %1955 = shalt.err (!%p1952_p0)
}
 0x4bf   :  { %s1956_s3 = scalar_lea.hbm %s2289_s10, 256 }
 0x4c0   :  { %p1957_p1 = scmp.ne.s32.totalorder %s2289_s10, %s1956_s3  ;;  %p1960_p2 = scmp.lt.u32.totalorder %s1956_s3, %s2289_s10 }
 0x4c2   :  { %p1962_p3 = pnand %p1960_p2, %p1957_p1 }
 0x4c4   :  { %1965 = shalt.err (!%p1962_p3)
}
 0x4c5   :  { %1143 = dma.vmem_to_hbm [thread:$0]  %s1138_s28, 256, %s2289_s10, [#allocation6], %s1982_s25, %s1982_s25, %s1983_s26  }
 0x4c6   :  { %1978 = dma.done.wait [#allocation6], 256  }
 0x4c7   :  { %1979 = vsyncadd [#allocation6], 4294967040 }
 0x4c8   :  { %1147 = vsyncpa [#allocation5], 1 }
 0x4c9   :  { %1148 = vsyncpa [#allocation8], 1 }
 0x4ca   :  { %1149 = vsyncpa [#allocation11], 1 }
 0x4cb   :  { %1150 = vsyncpa [#allocation14], 1 }
 0x4cc   :  { %1151 = vsyncpa [#allocation17], 1 }
 0x4cd   :  { %1152 = vsyncpa [#allocation20], 1 }
 0x4ce   :  { %1153 = vsyncpa [#allocation6], 1 }

</bundles_post_ra>
